<compile_context>
chip_gen: v7x
topology: tpu7x:2x2x1
jax: 0.10.0
libtpu: 0.0.40
codegen_flags: <defaults>
</compile_context>

<pallas_src>
import functools

import jax
import jax.numpy as jnp
from jax.experimental import pallas as pl
from jax.experimental.pallas import tpu as pltpu


def _round_up(x, m):
    return ((x + m - 1) // m) * m


def _pick_tile(n_pad, cap):
    """Largest multiple of 128 that divides n_pad and is <= cap."""
    m = n_pad // 128
    best = 1
    for d in range(1, m + 1):
        if m % d == 0 and 128 * d <= cap:
            best = d
    return 128 * best


# --------------------------------------------------------------------------
# Transform kernel:  T = X @ W   (bf16 inputs, f32 MXU accumulation, bf16 out)
# --------------------------------------------------------------------------
def transform_kernel(x_ref, w_ref, o_ref):
    t = jnp.dot(x_ref[...], w_ref[...], preferred_element_type=jnp.float32)
    o_ref[...] = t.astype(o_ref.dtype)


def transform(x_bf16, w_bf16, *, tm):
    n, f = x_bf16.shape
    fo = w_bf16.shape[1]
    return pl.pallas_call(
        transform_kernel,
        out_shape=jax.ShapeDtypeStruct((n, fo), jnp.bfloat16),
        grid=(n // tm,),
        in_specs=[
            pl.BlockSpec((tm, f), lambda i: (i, 0)),
            pl.BlockSpec((f, fo), lambda i: (0, 0)),   # weights stay resident
        ],
        out_specs=pl.BlockSpec((tm, fo), lambda i: (i, 0)),
        compiler_params=pltpu.CompilerParams(
            dimension_semantics=("parallel",)),
        cost_estimate=pl.CostEstimate(
            flops=2 * n * f * fo,
            transcendentals=0,
            bytes_accessed=n * f * 2 + f * fo * 2 + n * fo * 2),
    )(x_bf16, w_bf16)


# --------------------------------------------------------------------------
# Layer-1 propagation, fused with the layer-2 transform:
#   T2 = relu(A @ T1 + b1) @ W2     (dropout in eval mode is identity)
# --------------------------------------------------------------------------
def prop_fused_kernel(a_ref, t_ref, b1_ref, w2_ref, o_ref, acc_ref, *,
                      tk, t_resident):
    k = pl.program_id(1)

    @pl.when(k == 0)
    def _():
        acc_ref[...] = jnp.zeros_like(acc_ref)

    if t_resident:
        off = pl.multiple_of(k * tk, tk)
        t_blk = t_ref[pl.ds(off, tk), :]       # slice from the resident copy
    else:
        t_blk = t_ref[...]
    acc_ref[...] += jnp.dot(a_ref[...], t_blk,
                            preferred_element_type=jnp.float32)

    @pl.when(k == pl.num_programs(1) - 1)
    def _():
        h = jnp.maximum(acc_ref[...] + b1_ref[...], 0.0)       # bias + relu
        # fused layer-2 transform: t2 = h @ W2 (W2 resident, 32 KiB)
        t2 = jnp.dot(h.astype(jnp.bfloat16), w2_ref[...],
                     preferred_element_type=jnp.float32)
        o_ref[...] = t2.astype(o_ref.dtype)


def propagate_fused(a_bf16, t_bf16, b1, w2_bf16, *, tm, tk, t_resident,
                    vmem_limit):
    n = a_bf16.shape[0]
    fo = t_bf16.shape[1]
    co = w2_bf16.shape[1]
    grid = (n // tm, n // tk)
    if t_resident:
        t_spec = pl.BlockSpec((n, fo), lambda i, k: (0, 0))    # single DMA
        t_bytes = n * fo * 2
    else:
        t_spec = pl.BlockSpec((tk, fo), lambda i, k: (k, 0))
        t_bytes = n * fo * 2 * (n // tm)
    kernel = functools.partial(prop_fused_kernel, tk=tk, t_resident=t_resident)
    return pl.pallas_call(
        kernel,
        out_shape=jax.ShapeDtypeStruct((n, co), jnp.bfloat16),
        grid=grid,
        in_specs=[
            pl.BlockSpec((tm, tk), lambda i, k: (i, k)),       # A tile
            t_spec,                                            # T (resident)
            pl.BlockSpec((1, fo), lambda i, k: (0, 0)),        # b1, resident
            pl.BlockSpec((fo, co), lambda i, k: (0, 0)),       # W2, resident
        ],
        out_specs=pl.BlockSpec((tm, co), lambda i, k: (i, 0)),
        scratch_shapes=[pltpu.VMEM((tm, fo), jnp.float32)],
        compiler_params=pltpu.CompilerParams(
            dimension_semantics=("parallel", "arbitrary"),
            vmem_limit_bytes=vmem_limit),
        cost_estimate=pl.CostEstimate(
            flops=2 * n * n * fo + 2 * n * fo * co,
            transcendentals=0,
            bytes_accessed=n * n * 2 + t_bytes + n * co * 2
            + fo * 4 + fo * co * 2),
    )(a_bf16, t_bf16, b1, w2_bf16)


# --------------------------------------------------------------------------
# Layer-2 propagation:  Y = A @ T2 + b2, accumulating directly into the
# resident f32 output block (no VMEM scratch).
# --------------------------------------------------------------------------
def prop_kernel(a_ref, t_ref, b_ref, o_ref, *, tk, t_resident):
    k = pl.program_id(1)

    @pl.when(k == 0)
    def _():
        o_ref[...] = jnp.zeros_like(o_ref)

    if t_resident:
        off = pl.multiple_of(k * tk, tk)
        t_blk = t_ref[pl.ds(off, tk), :]
    else:
        t_blk = t_ref[...]
    o_ref[...] += jnp.dot(a_ref[...], t_blk,
                          preferred_element_type=jnp.float32)

    @pl.when(k == pl.num_programs(1) - 1)
    def _():
        o_ref[...] += b_ref[...]


def propagate(a_bf16, t_bf16, bias, *, tm, tk, t_resident, vmem_limit):
    n = a_bf16.shape[0]
    fo = t_bf16.shape[1]
    grid = (n // tm, n // tk)
    if t_resident:
        t_spec = pl.BlockSpec((n, fo), lambda i, k: (0, 0))
        t_bytes = n * fo * 2
    else:
        t_spec = pl.BlockSpec((tk, fo), lambda i, k: (k, 0))
        t_bytes = n * fo * 2 * (n // tm)
    kernel = functools.partial(prop_kernel, tk=tk, t_resident=t_resident)
    return pl.pallas_call(
        kernel,
        out_shape=jax.ShapeDtypeStruct((n, fo), jnp.float32),
        grid=grid,
        in_specs=[
            pl.BlockSpec((tm, tk), lambda i, k: (i, k)),       # A tile
            t_spec,                                            # T2
            pl.BlockSpec((1, fo), lambda i, k: (0, 0)),        # bias, resident
        ],
        out_specs=pl.BlockSpec((tm, fo), lambda i, k: (i, 0)),
        compiler_params=pltpu.CompilerParams(
            dimension_semantics=("parallel", "arbitrary"),
            vmem_limit_bytes=vmem_limit),
        cost_estimate=pl.CostEstimate(
            flops=2 * n * n * fo,
            transcendentals=0,
            bytes_accessed=n * n * 2 + t_bytes + n * fo * 4 + fo * 4),
    )(a_bf16, t_bf16, bias)


# --------------------------------------------------------------------------
# Glue: dense symmetric-normalized adjacency (matches PyG gcn_norm semantics)
# --------------------------------------------------------------------------
def build_normalized_adjacency(edge_index, num_nodes):
    src = edge_index[0]
    dst = edge_index[1]
    off_diag = (src != dst).astype(jnp.float32)
    A = jnp.zeros((num_nodes, num_nodes), jnp.float32)
    # scatter-ADD off-diagonal edges (duplicates accumulate, as in PyG MP);
    # existing self-loops are dropped and replaced below.
    A = A.at[dst, src].add(off_diag)
    # add_remaining_self_loops with edge_weight=ones, fill_value=1.
    A = A + jnp.eye(num_nodes, dtype=jnp.float32)
    deg = A.sum(axis=1)
    dinv = jnp.where(deg > 0, jax.lax.rsqrt(deg), 0.0)
    return dinv[:, None] * A * dinv[None, :]


# --------------------------------------------------------------------------
# Full forward pass
# --------------------------------------------------------------------------
def gcn_forward(x, edge_index, params):
    w1, b1, w2, b2 = params
    n, f = x.shape
    hidden = w1.shape[1]
    num_classes = w2.shape[1]

    a_norm = build_normalized_adjacency(edge_index, n)

    # --- padding: rows to 128 (decoupled from tile size), lanes to 128 ---
    n_pad = _round_up(n, 128)
    f_pad = _round_up(f, 128)
    h_pad = _round_up(hidden, 128)
    c_pad = _round_up(num_classes, 128)

    # tiles: keep >= 2 row tiles when possible (megacore on v7x); grow the
    # reduction tile to amortize per-grid-step overhead on the A stream.
    tm = _pick_tile(n_pad, min(512, max(128, n_pad // 2)))
    tk = _pick_tile(n_pad, 4096)

    # --- pad / cast operands: bf16 streams (A, X, W), f32 biases ---
    x_p = jnp.zeros((n_pad, f_pad), jnp.bfloat16).at[:n, :f].set(
        x.astype(jnp.bfloat16))
    a_p = jnp.zeros((n_pad, n_pad), jnp.bfloat16).at[:n, :n].set(
        a_norm.astype(jnp.bfloat16))            # no padded f32 intermediate
    w1_p = jnp.zeros((f_pad, h_pad), jnp.bfloat16).at[:f, :hidden].set(
        w1.astype(jnp.bfloat16))
    b1_p = jnp.zeros((1, h_pad), jnp.float32).at[:, :hidden].set(b1)
    w2_p = jnp.zeros((h_pad, c_pad), jnp.bfloat16).at[:hidden, :num_classes].set(
        w2.astype(jnp.bfloat16))
    b2_p = jnp.zeros((1, c_pad), jnp.float32).at[:, :num_classes].set(b2)

    t1_resident = (n_pad * h_pad * 2) <= (8 << 20)
    t2_resident = (n_pad * c_pad * 2) <= (8 << 20)

    vmem_need = (2 * tm * tk * 2                               # A double-buf
                 + 2 * (n_pad if t1_resident else tk) * h_pad * 2
                 + tm * h_pad * 4                              # f32 accumulator
                 + 2 * tm * c_pad * 4                          # output blocks
                 + h_pad * c_pad * 2 + 8 * h_pad)              # W2 + biases
    vmem_limit = int(min(max(vmem_need * 2, 32 << 20), 48 << 20))

    # Layer 1: transform -> propagate (+ bias, relu) fused with layer-2 X@W2.
    t1 = transform(x_p, w1_p, tm=tm)                           # bf16
    t2 = propagate_fused(a_p, t1, b1_p, w2_p, tm=tm, tk=tk,
                         t_resident=t1_resident, vmem_limit=vmem_limit)

    # F.dropout(training=False) -> identity (eval mode)

    # Layer 2: propagate (+ bias)
    y = propagate(a_p, t2, b2_p, tm=tm, tk=tk,
                  t_resident=t2_resident, vmem_limit=vmem_limit)

    return y[:n, :num_classes]


def gcn_reference(x, edge_index, params):
    w1, b1, w2, b2 = params
    n = x.shape[0]
    a = build_normalized_adjacency(edge_index, n)
    h = jnp.maximum(a @ (x @ w1) + b1, 0.0)
    return a @ (h @ w2) + b2


def init_params(key, num_features, hidden_channels, num_classes):
    ks = jax.random.split(key, 4)
    scale = 0.1
    w1 = scale * jax.random.normal(ks[0], (num_features, hidden_channels), jnp.float32)
    b1 = scale * jax.random.normal(ks[1], (1, hidden_channels), jnp.float32)
    w2 = scale * jax.random.normal(ks[2], (hidden_channels, num_classes), jnp.float32)
    b2 = scale * jax.random.normal(ks[3], (1, num_classes), jnp.float32)
    return (w1, b1, w2, b2)


if __name__ == "__main__":
    key = jax.random.PRNGKey(0)
    k_x, k_e, k_p = jax.random.split(key, 3)

    num_nodes = 16
    num_features = 8
    hidden_channels = 32
    num_classes = 4
    num_edges = 40

    x = jax.random.normal(k_x, (num_nodes, num_features), jnp.float32)
    edge_index = jax.random.randint(k_e, (2, num_edges), 0, num_nodes, jnp.int32)

    params = init_params(k_p, num_features, hidden_channels, num_classes)

    out = gcn_forward(x, edge_index, params)
    jax.block_until_ready(out)
    assert out.shape == (num_nodes, num_classes)

    ref = gcn_reference(x, edge_index, params)
    # bf16 A / activation streams -> loose tolerance vs the f32 reference.
    assert bool(jnp.allclose(out, ref, atol=1e-1, rtol=1e-1))

    print("KERNEL_OK")
</pallas_src>

<mosaic_0001>
module attributes {stable_mosaic.version = 11 : i64} {
  func.func @transform_kernel(%arg0: i32, %arg1: memref<128x128xbf16, #tpu.memory_space<vmem>>, %arg2: memref<128x128xbf16, #tpu.memory_space<vmem>>, %arg3: memref<128x128xbf16, #tpu.memory_space<vmem>>) attributes {dimension_semantics = [#tpu.dimension_semantics<parallel>], iteration_bounds = array<i64: 1>, scalar_prefetch = 0 : i64, scratch_operands = 0 : i64, tpu.core_type = #tpu.core_type<tc>, window_params = [{transform_indices = @transform_0, window_bounds = array<i64: 128, 128>}, {pipeline_mode = #tpu.pipeline_mode<synchronous>, transform_indices = @transform_1, window_bounds = array<i64: 128, 128>}, {transform_indices = @transform_2, window_bounds = array<i64: 128, 128>}]} {
    %c0 = arith.constant 0 : index
    %c0_0 = arith.constant 0 : index
    %0 = vector.load %arg1[%c0, %c0_0] : memref<128x128xbf16, #tpu.memory_space<vmem>>, vector<128x128xbf16>
    %c0_1 = arith.constant 0 : index
    %c0_2 = arith.constant 0 : index
    %1 = vector.load %arg2[%c0_1, %c0_2] : memref<128x128xbf16, #tpu.memory_space<vmem>>, vector<128x128xbf16>
    %cst = arith.constant dense<0.000000e+00> : vector<128x128xf32>
    %2 = tpu.matmul %0, %1, %cst {dimension_numbers = #tpu.dot_dimension_numbers<[1], [0], [0], [1], [0, 0, 1, 1], [], []>} : vector<128x128xbf16>, vector<128x128xbf16>, vector<128x128xf32> -> vector<128x128xf32>
    %3 = arith.truncf %2 : vector<128x128xf32> to vector<128x128xbf16>
    %c0_3 = arith.constant 0 : index
    %c0_4 = arith.constant 0 : index
    %4 = vector.load %arg3[%c0_3, %c0_4] : memref<128x128xbf16, #tpu.memory_space<vmem>>, vector<128x128xbf16>
    tpu.vector_store %arg3[%c0_3, %c0_4], %3 {strides = array<i32>} : memref<128x128xbf16, #tpu.memory_space<vmem>>, vector<128x128xbf16>,
    return
  }
  func.func @transform_0(%arg0: i32) -> (i32, i32) {
    %c0_i32 = arith.constant 0 : i32
    %c0_i32_0 = arith.constant 0 : i32
    return %arg0, %c0_i32 : i32, i32
  }
  func.func @transform_1(%arg0: i32) -> (i32, i32) {
    %c0_i32 = arith.constant 0 : i32
    %c0_i32_0 = arith.constant 0 : i32
    %c0_i32_1 = arith.constant 0 : i32
    return %c0_i32, %c0_i32_0 : i32, i32
  }
  func.func @transform_2(%arg0: i32) -> (i32, i32) {
    %c0_i32 = arith.constant 0 : i32
    %c0_i32_0 = arith.constant 0 : i32
    return %arg0, %c0_i32 : i32, i32
  }
}

</mosaic_0001>

<bundles_post_ra>
// kernel: tpu_custom_call.1
= control target key start
LH: loop header
LB: loop body
LE: loop exit
PB: predicated region body
PF: predicated region fallthrough
CT: control target
= control target key end

     0   :  { %7 = vsyncpa [#allocation3], 0  ;;  %s681_s0 = inlined_call_operand.hbm [shape: bf16[128,128], index: 0, kind: input, shape index: {}]   ;;  %s682_s1 = inlined_call_operand.hbm [shape: bf16[128,128], index: 1, kind: input, shape index: {}]   ;;  %s683_s2 = inlined_call_operand.hbm [shape: bf16[128,128], index: 2, kind: output, shape index: {}]  }
   0x1   :  { %8 = vsyncpa [#allocation6], 0 }
   0x2   :  { %9 = vsyncpa [#allocation4], 0  ;;  %s616_s9 = smov [#allocation2]   ;;  %s544_s13 = scalar_lea.hbm %s681_s0, 1024 }
   0x3   :  { %s15_s10 = sshll.u32 %s616_s9, 4  ;;  %p545_p0 = scmp.ne.s32.totalorder %s681_s0, %s544_s13  ;;  %s16_s10 = int_to_ptr.vmem [resolvable:$true] %s15_s10 }
   0x4   :  { %p548_p1 = scmp.lt.u32.totalorder %s544_s13, %s681_s0 }
   0x6   :  { %p550_p2 = pnand %p548_p1, %p545_p0 }
   0x8   :  { %553 = shalt.err (!%p550_p2)
}
   0x9   :  { %s554_s18 = scalar_lea.vmem %s16_s10, 1024  ;;  %p559_p4 = scmp.lt.s32.totalorder %s16_s10, %s16_s10 }
   0xa   :  { %p555_p3 = scmp.ne.s32.totalorder %s16_s10, %s554_s18  ;;  %p560_p5 = scmp.lt.s32.totalorder %s554_s18, %s554_s18 }
   0xc   :  { %p561_p6 = por %p560_p5, %p559_p4 }
   0xe   :  { %p562_p7 = pnand %p561_p6, %p555_p3 }
  0x10   :  { %565 = shalt.err (!%p562_p7)
}
  0x11   :  { %s617_s19 = smov 64   ;;  %s618_s20 = smov 4  }
  0x12   :  { %21 = dma.hbm_to_vmem [thread:$0]  %s681_s0, 1024, %s16_s10, [#allocation3], %s617_s19, %s617_s19, %s618_s20  }
  0x13   :  { %s619_s23 = smov [#allocation5]   ;;  %s566_s27 = scalar_lea.hbm %s682_s1, 1024 }
  0x14   :  { %s27_s24 = sshll.u32 %s619_s23, 4  ;;  %p567_p8 = scmp.ne.s32.totalorder %s682_s1, %s566_s27  ;;  %s28_s24 = int_to_ptr.vmem [resolvable:$true] %s27_s24 }
  0x15   :  { %p570_p9 = scmp.lt.u32.totalorder %s566_s27, %s682_s1 }
  0x17   :  { %p572_p10 = pnand %p570_p9, %p567_p8 }
  0x19   :  { %575 = shalt.err (!%p572_p10)
}
  0x1a   :  { %s576_s4 = scalar_lea.vmem %s28_s24, 1024  ;;  %p581_p12 = scmp.lt.s32.totalorder %s28_s24, %s28_s24 }
  0x1b   :  { %p577_p11 = scmp.ne.s32.totalorder %s28_s24, %s576_s4  ;;  %p582_p13 = scmp.lt.s32.totalorder %s576_s4, %s576_s4 }
  0x1d   :  { %p583_p0 = por %p582_p13, %p581_p12 }
  0x1f   :  { %p584_p1 = pnand %p583_p0, %p577_p11 }
  0x21   :  { %587 = shalt.err (!%p584_p1)
}
  0x22   :  { %33 = dma.hbm_to_vmem [thread:$0]  %s682_s1, 1024, %s28_s24, [#allocation6], %s617_s19, %s617_s19, %s618_s20  }
  0x23   :  { %610 = dma.done.wait [#allocation3], 1024  }
  0x24   :  { %611 = vsyncadd [#allocation3], 4294966272 }
  0x25   :  { %612 = dma.done.wait [#allocation6], 1024  }
  0x26   :  { %613 = vsyncadd [#allocation6], 4294966272  ;;  %v528_v0 = vld [vmem:[#allocation5] sm:$0xff]   ;;  %v529_v1 = vld [vmem:[#allocation5 + $0x8] sm:$0xff]   ;;  %s620_s1 = smov [#allocation7]  }
  0x27   :  { %475 = vmatprep.subr.bf16.mxu0 %v528_v0  ;;  %507 = vmatprep.subr.bf16.mxu1 %v528_v0  ;;  %v530_v2 = vld [vmem:[#allocation5 + $0x10] sm:$0xff]   ;;  %v531_v3 = vld [vmem:[#allocation5 + $0x18] sm:$0xff]   ;;  %v536_v4 = vld [vmem:[#allocation2] sm:$0xff]   ;;  %s351_s6 = sshll.u32 %s620_s1, 4  ;;  %s352_s6 = int_to_ptr.vmem [resolvable:$true] %s351_s6 }
  0x28   :  { %476 = vmatpush3.bf16.msra.mxu0 %v528_v0  ;;  %515 = vmatpush3.bf16.msra.mxu1 %v528_v0  ;;  %v537_v5 = vld [vmem:[#allocation2 + $0x20] sm:$0xff]   ;;  %v533_v7 = vld [vmem:[#allocation5 + $0x28] sm:$0xff]   ;;  %v534_v8 = vld [vmem:[#allocation5 + $0x30] sm:$0xff]   ;;  %s588_s7 = scalar_lea.vmem %s352_s6, 1024  ;;  %p593_p3 = scmp.lt.s32.totalorder %s352_s6, %s352_s6 }
  0x29   :  { %477 = vmatprep.subr.bf16.mxu0 %v529_v1  ;;  %508 = vmatprep.subr.bf16.mxu1 %v529_v1  ;;  %v532_v6 = vld [vmem:[#allocation5 + $0x20] sm:$0xff]   ;;  %v535_v9 = vld [vmem:[#allocation5 + $0x38] sm:$0xff]   ;;  %v538_v10 = vld [vmem:[#allocation2 + $0x8] sm:$0xff]   ;;  %p589_p2 = scmp.ne.s32.totalorder %s352_s6, %s588_s7  ;;  %p594_p4 = scmp.lt.s32.totalorder %s588_s7, %s588_s7 }
  0x2a   :  { %491 = vmatprep.mubr.bf16.mxu0 %v536_v4  ;;  %499 = vmatprep.mubr.bf16.mxu1 %v537_v5  ;;  %v539_v11 = vld [vmem:[#allocation2 + $0x28] sm:$0xff]   ;;  %v540_v12 = vld [vmem:[#allocation2 + $0x10] sm:$0xff]   ;;  %v542_v14 = vld [vmem:[#allocation2 + $0x18] sm:$0xff]  }
  0x2b   :  { %v541_v13 = vld [vmem:[#allocation2 + $0x30] sm:$0xff]   ;;  %v543_v15 = vld [vmem:[#allocation2 + $0x38] sm:$0xff]   ;;  %p595_p5 = por %p594_p4, %p593_p3 }
  0x2c   :  { %478 = vmatpush3.bf16.msra.mxu0 %v529_v1  ;;  %516 = vmatpush3.bf16.msra.mxu1 %v529_v1 }
  0x2d   :  { %479 = vmatprep.subr.bf16.mxu0 %v530_v2  ;;  %509 = vmatprep.subr.bf16.mxu1 %v530_v2  ;;  %p596_p6 = pnand %p595_p5, %p589_p2 }
  0x30   :  { %480 = vmatpush3.bf16.msra.mxu0 %v530_v2  ;;  %517 = vmatpush3.bf16.msra.mxu1 %v530_v2 }
  0x31   :  { %481 = vmatprep.subr.bf16.mxu0 %v531_v3  ;;  %510 = vmatprep.subr.bf16.mxu1 %v531_v3 }
  0x34   :  { %482 = vmatpush3.bf16.msra.mxu0 %v531_v3  ;;  %518 = vmatpush3.bf16.msra.mxu1 %v531_v3 }
  0x35   :  { %483 = vmatprep.subr.bf16.mxu0 %v532_v6  ;;  %511 = vmatprep.subr.bf16.mxu1 %v532_v6 }
  0x38   :  { %484 = vmatpush3.bf16.msra.mxu0 %v532_v6  ;;  %519 = vmatpush3.bf16.msra.mxu1 %v532_v6 }
  0x39   :  { %485 = vmatprep.subr.bf16.mxu0 %v533_v7  ;;  %512 = vmatprep.subr.bf16.mxu1 %v533_v7 }
  0x3c   :  { %486 = vmatpush3.bf16.msra.mxu0 %v533_v7  ;;  %520 = vmatpush3.bf16.msra.mxu1 %v533_v7 }
  0x3d   :  { %487 = vmatprep.subr.bf16.mxu0 %v534_v8  ;;  %513 = vmatprep.subr.bf16.mxu1 %v534_v8 }
  0x40   :  { %488 = vmatpush3.bf16.msra.mxu0 %v534_v8  ;;  %521 = vmatpush3.bf16.msra.mxu1 %v534_v8 }
  0x41   :  { %489 = vmatprep.subr.bf16.mxu0 %v535_v9  ;;  %514 = vmatprep.subr.bf16.mxu1 %v535_v9 }
  0x44   :  { %490 = vmatpush3.bf16.msra.mxu0 %v535_v9  ;;  %522 = vmatpush3.bf16.msra.mxu1 %v535_v9 }
  0x47   :  { %492 = vmatmul.mubr.bf16.vlgmr.msra.gmra.mrb[0].mxu0 %v538_v10  ;;  %500 = vmatmul.mubr.bf16.vlgmr.msra.gmra.mrb[0].mxu1 %v539_v11 }
  0x48   :  { %495 = vmatprep.mubr.bf16.mxu0 %v540_v12  ;;  %503 = vmatprep.mubr.bf16.mxu1 %v541_v13 }
  0x4f   :  { %496 = vmatmul.mubr.bf16.gmra.mrb[4].mxu0 %v542_v14  ;;  %504 = vmatmul.mubr.bf16.gmra.mrb[4].mxu1 %v543_v15 }
 0x11a   :  { %v493_v16 = vpop.f32.mrb[0].mxu0  ;;  %v501_v17 = vpop.f32.mrb[0].mxu1 }
 0x11b   :  { %v203_v18 = vpop.f32.mrb[1].mxu0  ;;  %v235_v19 = vpop.f32.mrb[1].mxu1 }
 0x11c   :  { %v494_v20 = vpop.f32.mrb[2].mxu0  ;;  %v502_v21 = vpop.f32.mrb[2].mxu1 }
 0x11d   :  { %v420_v22 = vpack.c.bf16 %v494_v20, %v493_v16  ;;  %v440_v23 = vpack.c.bf16 %v502_v21, %v501_v17  ;;  %v206_v24 = vpop.f32.mrb[3].mxu0  ;;  %v238_v25 = vpop.f32.mrb[3].mxu1 }
 0x11e   :  { %v415_v26 = vpack.c.bf16 %v206_v24, %v203_v18  ;;  %v435_v27 = vpack.c.bf16 %v238_v25, %v235_v19 }
 0x11f   :  { %452 = vst [vmem:[#allocation7 + $0x8] sm:$0xff] %v420_v22   ;;  %456 = vst [vmem:[#allocation7 + $0x28] sm:$0xff] %v440_v23  }
 0x120   :  { %416 = vst [vmem:[#allocation7] sm:$0xff] %v415_v26   ;;  %455 = vst [vmem:[#allocation7 + $0x20] sm:$0xff] %v435_v27  }
 0x122   :  { %v497_v28 = vpop.f32.mrb[4].mxu0  ;;  %v505_v29 = vpop.f32.mrb[4].mxu1 }
 0x123   :  { %v219_v30 = vpop.f32.mrb[5].mxu0  ;;  %v251_v31 = vpop.f32.mrb[5].mxu1 }
 0x124   :  { %v498_v32 = vpop.f32.mrb[6].mxu0  ;;  %v506_v33 = vpop.f32.mrb[6].mxu1 }
 0x125   :  { %v430_v34 = vpack.c.bf16 %v498_v32, %v497_v28  ;;  %v450_v35 = vpack.c.bf16 %v506_v33, %v505_v29  ;;  %v222_v36 = vpop.f32.mrb[7].mxu0  ;;  %v254_v37 = vpop.f32.mrb[7].mxu1 }
 0x126   :  { %v425_v38 = vpack.c.bf16 %v222_v36, %v219_v30  ;;  %v445_v39 = vpack.c.bf16 %v254_v37, %v251_v31 }
 0x127   :  { %454 = vst [vmem:[#allocation7 + $0x18] sm:$0xff] %v430_v34   ;;  %458 = vst [vmem:[#allocation7 + $0x38] sm:$0xff] %v450_v35  }
 0x128   :  { %453 = vst [vmem:[#allocation7 + $0x10] sm:$0xff] %v425_v38   ;;  %457 = vst [vmem:[#allocation7 + $0x30] sm:$0xff] %v445_v39  }
 0x129   :  { %599 = shalt.err (!%p596_p6)
}
 0x12a   :  { %s600_s10 = scalar_lea.hbm %s683_s2, 1024 }
 0x12b   :  { %p601_p7 = scmp.ne.s32.totalorder %s683_s2, %s600_s10  ;;  %p604_p8 = scmp.lt.u32.totalorder %s600_s10, %s683_s2 }
 0x12d   :  { %p606_p9 = pnand %p604_p8, %p601_p7 }
 0x12f   :  { %609 = shalt.err (!%p606_p9)
}
 0x130   :  { %357 = dma.vmem_to_hbm [thread:$0]  %s352_s6, 1024, %s683_s2, [#allocation4], %s617_s19, %s617_s19, %s618_s20  }
 0x131   :  { %614 = dma.done.wait [#allocation4], 1024  }
 0x132   :  { %615 = vsyncadd [#allocation4], 4294966272 }
 0x133   :  { %361 = vsyncpa [#allocation3], 1 }
 0x134   :  { %362 = vsyncpa [#allocation6], 1 }
 0x135   :  { %363 = vsyncpa [#allocation4], 1 }

</bundles_post_ra>
